<compile_context>
chip_gen: v5e
topology: v5e:2x2
jax: 0.10.0
libtpu: 0.0.40
codegen_flags: <defaults>
</compile_context>

<pallas_src>
import functools
import math

import jax
import jax.numpy as jnp
from jax.experimental import pallas as pl
from jax.experimental.pallas import tpu as pltpu

_LOG2PI = math.log(2.0 * math.pi)
_DEFAULT_TB = 512  # lane-dim tile over batch; multiple of 128


def _round_up(x, m):
    return ((x + m - 1) // m) * m


# --------------------------------------------------------------------------
# Categorical fused kernel: gathered log_prob, entropy, argmax mode.
# Layout: batch on lanes, action dim on sublanes.
# --------------------------------------------------------------------------
def _categorical_kernel(logits_ref, act_ref, lp_ref, ent_ref, mode_ref):
    logits = logits_ref[...].astype(jnp.float32)          # (A, TB)
    acts = act_ref[...]                                    # (1, TB) int32

    a, tb = logits.shape
    m = jnp.max(logits, axis=0, keepdims=True)             # (1, TB)
    z = logits - m
    ez = jnp.exp(z)
    sez = jnp.sum(ez, axis=0, keepdims=True)                # (1, TB)
    log_sez = jnp.log(sez)

    row = jax.lax.broadcasted_iota(jnp.int32, (a, tb), 0)

    # Categorical.log_prob(x): gather log_softmax at the action index.
    onehot = (row == acts).astype(jnp.float32)
    lp_ref[...] = jnp.sum(onehot * z, axis=0, keepdims=True) - log_sez

    # Entropy = log(sez) - sum(ez * z) / sez  (avoids full logp / p temporaries).
    s_ezz = jnp.sum(ez * z, axis=0, keepdims=True)
    ent_ref[...] = log_sez - s_ezz / sez

    # mode(): argmax over A (first index on ties).
    is_max = logits == m
    mode_ref[...] = jnp.min(jnp.where(is_max, row, a), axis=0, keepdims=True)


@functools.partial(jax.jit, static_argnames=("tb",))
def categorical_ops(logits, actions, tb=_DEFAULT_TB):
    """logits: (B, A); actions: (B,) or (B,1) int -> (lp (B,), ent (B,), mode (B,))."""
    B, A = logits.shape
    acts = actions.reshape(-1).astype(jnp.int32)

    tb = min(tb, _round_up(B, 128))
    Bp = _round_up(B, tb)

    logits_t = jnp.pad(logits.astype(jnp.float32), ((0, Bp - B), (0, 0))).T  # (A, Bp)
    acts_t = jnp.pad(acts, (0, Bp - B)).reshape(1, Bp)                        # (1, Bp)

    lp, ent, mode = pl.pallas_call(
        _categorical_kernel,
        out_shape=(
            jax.ShapeDtypeStruct((1, Bp), jnp.float32),   # log_prob
            jax.ShapeDtypeStruct((1, Bp), jnp.float32),   # entropy
            jax.ShapeDtypeStruct((1, Bp), jnp.int32),     # mode
        ),
        grid=(Bp // tb,),
        in_specs=[
            pl.BlockSpec((A, tb), lambda i: (0, i)),
            pl.BlockSpec((1, tb), lambda i: (0, i)),
        ],
        out_specs=(
            pl.BlockSpec((1, tb), lambda i: (0, i)),
            pl.BlockSpec((1, tb), lambda i: (0, i)),
            pl.BlockSpec((1, tb), lambda i: (0, i)),
        ),
        compiler_params=pltpu.CompilerParams(dimension_semantics=("parallel",)),
    )(logits_t, acts_t)

    return lp[0, :B], ent[0, :B], mode[0, :B]


# --------------------------------------------------------------------------
# Diagonal Normal kernel: log_prob summed over the action dim (lane-dense).
# entropy / mode have no per-sample compute and are handled in glue.
# --------------------------------------------------------------------------
def _normal_kernel(loc_ref, act_ref, inv_std_ref, lp_ref):
    diff = act_ref[...].astype(jnp.float32) - loc_ref[...].astype(jnp.float32)  # (A, TB)
    z = diff * inv_std_ref[...]                                                  # (A,1) bcast
    lp_ref[...] = -0.5 * jnp.sum(z * z, axis=0, keepdims=True)                   # (1, TB)


@functools.partial(jax.jit, static_argnames=("tb",))
def normal_log_prob(loc, actions, logstd, tb=_DEFAULT_TB):
    """loc/actions: (B, A); logstd: (A,) or (1,) -> log_prob (B, 1)."""
    B, A = loc.shape
    logstd = jnp.broadcast_to(logstd.astype(jnp.float32).reshape(-1), (A,))
    inv_std = jnp.exp(-logstd).reshape(A, 1)
    const = jnp.sum(-logstd) - 0.5 * A * _LOG2PI          # batch-independent term

    tb = min(tb, _round_up(B, 128))
    Bp = _round_up(B, tb)

    loc_t = jnp.pad(loc.astype(jnp.float32), ((0, Bp - B), (0, 0))).T     # (A, Bp)
    act_t = jnp.pad(actions.astype(jnp.float32), ((0, Bp - B), (0, 0))).T  # (A, Bp)

    lp = pl.pallas_call(
        _normal_kernel,
        out_shape=jax.ShapeDtypeStruct((1, Bp), jnp.float32),
        grid=(Bp // tb,),
        in_specs=[
            pl.BlockSpec((A, tb), lambda i: (0, i)),
            pl.BlockSpec((A, tb), lambda i: (0, i)),
            pl.BlockSpec((A, 1), lambda i: (0, 0)),
        ],
        out_specs=pl.BlockSpec((1, tb), lambda i: (0, i)),
        compiler_params=pltpu.CompilerParams(dimension_semantics=("parallel",)),
    )(loc_t, act_t, inv_std)

    return (lp[0, :B] + const).reshape(B, 1)


# --------------------------------------------------------------------------
# Glue mirroring ActionDistribution / Categorical / Normal / Reparameterization
# --------------------------------------------------------------------------
class PallasCategorical:
    def __init__(self, logits):
        self.logits = logits
        self._ent = None
        self._mode = None

    def sample(self, key):
        # TODO(synk): sampling randomness (Gumbel-max) stays in plain JAX glue.
        g = -jnp.log(-jnp.log(jax.random.uniform(key, self.logits.shape) + 1e-20) + 1e-20)
        return jnp.argmax(self.logits + g, axis=-1, keepdims=True).astype(jnp.int32)

    def _run(self, actions):
        lp, ent, mode = categorical_ops(self.logits, actions)
        self._ent = ent                                   # (B,) like torch entropy()
        self._mode = mode.reshape(-1, 1)                  # (B,1) keepdim=True
        return lp

    def log_prob(self, actions):
        lp = self._run(actions)
        return lp.reshape(actions.shape)                  # reshape_as(x)

    def entropy(self):
        if self._ent is None:
            dummy = jnp.zeros((self.logits.shape[0],), jnp.int32)
            self._run(dummy)
        return self._ent

    def mode(self):
        if self._mode is None:
            dummy = jnp.zeros((self.logits.shape[0],), jnp.int32)
            self._run(dummy)
        return self._mode


class PallasNormal:
    def __init__(self, loc, logstd):
        self.loc = loc
        self.logstd = logstd

    def rsample(self, key):
        # TODO(synk): rsample noise stays in plain JAX glue.
        A = self.loc.shape[-1]
        std = jnp.exp(jnp.broadcast_to(self.logstd.reshape(-1), (A,)))
        eps = jax.random.normal(key, self.loc.shape, self.loc.dtype)
        return self.loc + std[None, :] * eps

    sample = rsample  # has_rsample=True -> Reparameterization uses rsample

    def log_prob(self, actions):
        return normal_log_prob(self.loc, actions, self.logstd)

    def entropy(self):
        # Batch-independent: computed once in plain JAX, broadcast to (B, 1).
        B, A = self.loc.shape
        logstd = jnp.broadcast_to(self.logstd.astype(jnp.float32).reshape(-1), (A,))
        ent = jnp.sum(0.5 + 0.5 * _LOG2PI + logstd)
        return jnp.broadcast_to(ent.reshape(1, 1), (B, 1))

    def mode(self):
        return self.loc                                   # mode() == mean


class ActionDistributionPallas:
    """Pallas equivalent of cherry's ActionDistribution."""

    def __init__(self, is_discrete, action_size=None, logstd=None,
                 use_probs=False, reparam=False):
        self.is_discrete = is_discrete
        self.use_probs = use_probs
        self.reparam = reparam
        if not is_discrete:
            if logstd is None:
                logstd = jnp.zeros((action_size,), jnp.float32)  # nn.Parameter(zeros)
            elif isinstance(logstd, (float, int)):
                logstd = jnp.array([float(logstd)], jnp.float32)
            self.logstd = logstd

    def __call__(self, x):
        if self.is_discrete:
            logits = jnp.log(x) if self.use_probs else x
            return PallasCategorical(logits)
        density = PallasNormal(x, self.logstd)
        # Reparameterization wrapper is a pure dispatch shim; PallasNormal
        # already exposes rsample, so the wrapper is behaviorally identical.
        return density


# --------------------------------------------------------------------------
# Demo + reference check
# --------------------------------------------------------------------------
if __name__ == "__main__":
    key = jax.random.PRNGKey(0)
    k1, k2, k3, k4 = jax.random.split(key, 4)

    # ---- Discrete case: B=16 samples, 6 discrete actions ----
    B, A_disc = 16, 6
    logits = jax.random.normal(k1, (B, A_disc), jnp.float32)
    disc_actions = jax.random.randint(k2, (B, 1), 0, A_disc, jnp.int32)

    dist_disc = ActionDistributionPallas(is_discrete=True)(logits)
    lp_d = dist_disc.log_prob(disc_actions)      # (B, 1)
    ent_d = dist_disc.entropy()                  # (B,)  (cached, no extra launch)
    mode_d = dist_disc.mode()                    # (B, 1) (cached)
    jax.block_until_ready((lp_d, ent_d, mode_d))

    logp_ref = jax.nn.log_softmax(logits, axis=-1)
    lp_ref = jnp.take_along_axis(logp_ref, disc_actions, axis=-1)
    ent_ref = -jnp.sum(jnp.exp(logp_ref) * logp_ref, axis=-1)
    mode_ref = jnp.argmax(logits, axis=-1, keepdims=True)
    assert lp_d.shape == (B, 1) and ent_d.shape == (B,) and mode_d.shape == (B, 1)
    assert jnp.allclose(lp_d, lp_ref, atol=1e-5)
    assert jnp.allclose(ent_d, ent_ref, atol=1e-5)
    assert jnp.all(mode_d == mode_ref)

    # ---- Continuous case: B=16 samples, 4-dim action, logstd=zeros param ----
    A_cont = 4
    loc = jax.random.normal(k3, (B, A_cont), jnp.float32)
    cont_actions = loc + 0.1 * jax.random.normal(k4, (B, A_cont), jnp.float32)

    ad_cont = ActionDistributionPallas(is_discrete=False, action_size=A_cont,
                                       reparam=True)
    dist_cont = ad_cont(loc)
    lp_c = dist_cont.log_prob(cont_actions)
    ent_c = dist_cont.entropy()
    mode_c = dist_cont.mode()
    jax.block_until_ready((lp_c, ent_c, mode_c))

    std = jnp.exp(ad_cont.logstd)[None, :]
    lp_c_ref = jnp.sum(-0.5 * ((cont_actions - loc) / std) ** 2
                       - jnp.log(std) - 0.5 * math.log(2 * math.pi),
                       axis=-1, keepdims=True)
    ent_c_ref = jnp.sum(0.5 + 0.5 * math.log(2 * math.pi)
                        + jnp.log(std), axis=-1, keepdims=True)
    ent_c_ref = jnp.broadcast_to(ent_c_ref, (B, 1))
    assert lp_c.shape == (B, 1) and ent_c.shape == (B, 1) and mode_c.shape == (B, A_cont)
    assert jnp.allclose(lp_c, lp_c_ref, atol=1e-5)
    assert jnp.allclose(ent_c, ent_c_ref, atol=1e-5)
    assert jnp.allclose(mode_c, loc, atol=1e-6)

    print("KERNEL_OK")
</pallas_src>

<mosaic_0001>
module attributes {stable_mosaic.version = 11 : i64} {
  func.func @_categorical_kernel(%arg0: i32, %arg1: memref<6x128xf32, #tpu.memory_space<vmem>>, %arg2: memref<1x128xi32, #tpu.memory_space<vmem>>, %arg3: memref<1x128xf32, #tpu.memory_space<vmem>>, %arg4: memref<1x128xf32, #tpu.memory_space<vmem>>, %arg5: memref<1x128xi32, #tpu.memory_space<vmem>>) attributes {dimension_semantics = [#tpu.dimension_semantics<parallel>], iteration_bounds = array<i64: 1>, scalar_prefetch = 0 : i64, scratch_operands = 0 : i64, tpu.core_type = #tpu.core_type<tc>, window_params = [{transform_indices = @transform_0, window_bounds = array<i64: 6, 128>}, {transform_indices = @transform_1, window_bounds = array<i64: 1, 128>}, {transform_indices = @transform_2, window_bounds = array<i64: 1, 128>}, {transform_indices = @transform_3, window_bounds = array<i64: 1, 128>}, {transform_indices = @transform_4, window_bounds = array<i64: 1, 128>}]} {
    %c0 = arith.constant 0 : index
    %c0_0 = arith.constant 0 : index
    %0 = vector.load %arg1[%c0, %c0_0] : memref<6x128xf32, #tpu.memory_space<vmem>>, vector<6x128xf32>
    %c0_1 = arith.constant 0 : index
    %c0_2 = arith.constant 0 : index
    %1 = vector.load %arg2[%c0_1, %c0_2] : memref<1x128xi32, #tpu.memory_space<vmem>>, vector<1x128xi32>
    %cst = arith.constant dense<0xFF800000> : vector<128xf32>
    %2 = vector.multi_reduction <maximumf>, %0, %cst [0] : vector<6x128xf32> to vector<128xf32>
    %3 = vector.shape_cast %2 : vector<128xf32> to vector<1x128xf32>
    %4 = vector.broadcast %3 : vector<1x128xf32> to vector<6x128xf32>
    %5 = arith.subf %0, %4 : vector<6x128xf32>
    %6 = math.exp %5 : vector<6x128xf32>
    %cst_3 = arith.constant dense<0.000000e+00> : vector<128xf32>
    %7 = vector.multi_reduction <add>, %6, %cst_3 [0] : vector<6x128xf32> to vector<128xf32>
    %8 = vector.shape_cast %7 : vector<128xf32> to vector<1x128xf32>
    %9 = math.log %8 : vector<1x128xf32>
    %10 = tpu.iota {dimensions = array<i32: 0>} : vector<6x128xi32>
    %11 = vector.broadcast %1 : vector<1x128xi32> to vector<6x128xi32>
    %12 = arith.cmpi eq, %10, %11 : vector<6x128xi32>
    %13 = arith.extui %12 : vector<6x128xi1> to vector<6x128xi32>
    %14 = arith.sitofp %13 : vector<6x128xi32> to vector<6x128xf32>
    %15 = arith.mulf %14, %5 : vector<6x128xf32>
    %cst_4 = arith.constant dense<0.000000e+00> : vector<128xf32>
    %16 = vector.multi_reduction <add>, %15, %cst_4 [0] : vector<6x128xf32> to vector<128xf32>
    %17 = vector.shape_cast %16 : vector<128xf32> to vector<1x128xf32>
    %18 = arith.subf %17, %9 : vector<1x128xf32>
    %c0_5 = arith.constant 0 : index
    %c0_6 = arith.constant 0 : index
    %19 = vector.load %arg3[%c0_5, %c0_6] : memref<1x128xf32, #tpu.memory_space<vmem>>, vector<1x128xf32>
    tpu.vector_store %arg3[%c0_5, %c0_6], %18 {strides = array<i32>} : memref<1x128xf32, #tpu.memory_space<vmem>>, vector<1x128xf32>,
    %20 = arith.mulf %6, %5 : vector<6x128xf32>
    %cst_7 = arith.constant dense<0.000000e+00> : vector<128xf32>
    %21 = vector.multi_reduction <add>, %20, %cst_7 [0] : vector<6x128xf32> to vector<128xf32>
    %22 = vector.shape_cast %21 : vector<128xf32> to vector<1x128xf32>
    %23 = arith.divf %22, %8 : vector<1x128xf32>
    %24 = arith.subf %9, %23 : vector<1x128xf32>
    %c0_8 = arith.constant 0 : index
    %c0_9 = arith.constant 0 : index
    %25 = vector.load %arg4[%c0_8, %c0_9] : memref<1x128xf32, #tpu.memory_space<vmem>>, vector<1x128xf32>
    tpu.vector_store %arg4[%c0_8, %c0_9], %24 {strides = array<i32>} : memref<1x128xf32, #tpu.memory_space<vmem>>, vector<1x128xf32>,
    %26 = vector.broadcast %3 : vector<1x128xf32> to vector<6x128xf32>
    %27 = arith.cmpf oeq, %0, %26 : vector<6x128xf32>
    %c6_i32 = arith.constant 6 : i32
    %28 = vector.broadcast %c6_i32 : i32 to vector<6x128xi32>
    %29 = arith.select %27, %10, %28 : vector<6x128xi1>, vector<6x128xi32>
    %cst_10 = arith.constant dense<2147483647> : vector<128xi32>
    %30 = vector.multi_reduction <minsi>, %29, %cst_10 [0] : vector<6x128xi32> to vector<128xi32>
    %31 = vector.shape_cast %30 : vector<128xi32> to vector<1x128xi32>
    %c0_11 = arith.constant 0 : index
    %c0_12 = arith.constant 0 : index
    %32 = vector.load %arg5[%c0_11, %c0_12] : memref<1x128xi32, #tpu.memory_space<vmem>>, vector<1x128xi32>
    tpu.vector_store %arg5[%c0_11, %c0_12], %31 {strides = array<i32>} : memref<1x128xi32, #tpu.memory_space<vmem>>, vector<1x128xi32>,
    return
  }
  func.func @transform_0(%arg0: i32) -> (i32, i32) {
    %c0_i32 = arith.constant 0 : i32
    %c0_i32_0 = arith.constant 0 : i32
    return %c0_i32, %arg0 : i32, i32
  }
  func.func @transform_1(%arg0: i32) -> (i32, i32) {
    %c0_i32 = arith.constant 0 : i32
    %c0_i32_0 = arith.constant 0 : i32
    return %c0_i32, %arg0 : i32, i32
  }
  func.func @transform_2(%arg0: i32) -> (i32, i32) {
    %c0_i32 = arith.constant 0 : i32
    %c0_i32_0 = arith.constant 0 : i32
    return %c0_i32, %arg0 : i32, i32
  }
  func.func @transform_3(%arg0: i32) -> (i32, i32) {
    %c0_i32 = arith.constant 0 : i32
    %c0_i32_0 = arith.constant 0 : i32
    return %c0_i32, %arg0 : i32, i32
  }
  func.func @transform_4(%arg0: i32) -> (i32, i32) {
    %c0_i32 = arith.constant 0 : i32
    %c0_i32_0 = arith.constant 0 : i32
    return %c0_i32, %arg0 : i32, i32
  }
}

</mosaic_0001>

<bundles_post_ra>
// kernel: categorical_ops.1
= control target key start
LH: loop header
LB: loop body
LE: loop exit
PB: predicated region body
PF: predicated region fallthrough
CT: control target
= control target key end

     0   :  { %vm16_vm0 = vcmask 1045504   ;;  %v36_v4 = vlaneseq  ;;  %v111_v11 = vmov 0.0   ;;  %s157_s0 = inlined_call_operand.vmem [shape: f32[6,128], index: 0, kind: input, shape index: {}]   ;;  %s158_s1 = inlined_call_operand.vmem [shape: s32[1,128], index: 1, kind: input, shape index: {}]   ;;  %s159_s4 = inlined_call_operand.vmem [shape: s32[1,128], index: 4, kind: output, shape index: {2}]   ;;  %s160_s2 = inlined_call_operand.vmem [shape: f32[1,128], index: 2, kind: output, shape index: {0}]   ;;  %s161_s3 = inlined_call_operand.vmem [shape: f32[1,128], index: 3, kind: output, shape index: {1}]  }
   0x1   :  { %v14_v0 = vld [vmem:[%s157_s0] sm:$0x3f] }
   0x2   :  { %v17_v1 = vsel %vm16_vm0, %v14_v0, -inf  ;;  %v37_v6 = vshrl.u32 %v36_v4, 7  ;;  %v104_v7 = vld [vmem:[%s158_s1] ss:$0 sm:$0xff] }
   0x3   :  { %v18_v2 = vrot.slane %v17_v1, 4 }
   0x4   :  { %vm39_vm1 = vcmp.eq.s32.totalorder %v37_v6, %v104_v7 }
   0x5   :  { %v19_v3 = vmax.f32 %v17_v1, %v18_v2  ;;  %v102_v12 = vsel %vm39_vm1, 1.0, %v111_v11 }
   0x7   :  { %v20_v5 = vrot.slane %v19_v3, 2 }
   0x9   :  { %v21_v8 = vmax.f32 %v19_v3, %v20_v5 }
   0xb   :  { %v22_v9 = vrot.slane %v21_v8, 1 }
   0xd   :  { %v23_v10 = vmax.f32 %v21_v8, %v22_v9 }
   0xf   :  { %v24_v13 = vsub.f32 %v14_v0, %v23_v10  ;;  %vm77_vm2 = vcmp.eq.f32.partialorder %v14_v0, %v23_v10 }
  0x10   :  { %v78_v14 = vsel %vm77_vm2, %v37_v6, 6 }
  0x11   :  { %v25_v15 = vmul.f32 1.442695, %v24_v13  ;;  %v42_v16 = vmul.f32 %v102_v12, %v24_v13  ;;  %v79_v17 = vsel %vm16_vm0, %v78_v14, 2147483647 }
  0x12   :  { %v80_v18 = vrot.slane %v79_v17, 4 }
  0x13   :  { %105 = vpow2.f32 %v25_v15  ;;  %v43_v19 = vsel %vm16_vm0, %v42_v16, 0.0 }
  0x14   :  { %vm81_vm3 = vcmp.lt.s32.totalorder %v79_v17, %v80_v18  ;;  %v44_v22 = vrot.slane %v43_v19, 4 }
  0x15   :  { %v82_v20 = vsel %vm81_vm3, %v79_v17, %v80_v18 }
  0x16   :  { %v83_v21 = vrot.slane %v82_v20, 2  ;;  %v45_v29 = vadd.f32 %v44_v22, %v43_v19 }
  0x18   :  { %vm84_vm4 = vcmp.lt.s32.totalorder %v82_v20, %v83_v21  ;;  %v46_v34 = vrot.slane %v45_v29, 2 }
  0x19   :  { %v106_v23 = vpop.eup %105  ;;  %v85_v24 = vsel %vm84_vm4, %v82_v20, %v83_v21 }
  0x1a   :  { %v27_v25 = vsel %vm16_vm0, %v106_v23, 0.0  ;;  %v52_v26 = vmul.f32 %v106_v23, %v24_v13  ;;  %v86_v27 = vrot.slane %v85_v24, 1  ;;  %v47_v38 = vadd.f32 %v46_v34, %v45_v29 }
  0x1b   :  { %v28_v28 = vrot.slane %v27_v25, 4 }
  0x1c   :  { %vm87_vm5 = vcmp.lt.s32.totalorder %v85_v24, %v86_v27  ;;  %v53_v31 = vsel %vm16_vm0, %v52_v26, 0.0  ;;  %v48_v41 = vrot.slane %v47_v38, 1 }
  0x1d   :  { %v29_v30 = vadd.f32 %v28_v28, %v27_v25  ;;  %v88_v32 = vsel %vm87_vm5, %v85_v24, %v86_v27  ;;  %v54_v35 = vrot.slane %v53_v31, 4 }
  0x1e   :  { %89 = vst [vmem:[%s159_s4] sm:$0x1] %v88_v32  ;;  %v49_v43 = vadd.f32 %v48_v41, %v47_v38 }
  0x1f   :  { %v30_v33 = vrot.slane %v29_v30, 2  ;;  %v55_v39 = vadd.f32 %v54_v35, %v53_v31 }
  0x21   :  { %v31_v36 = vadd.f32 %v30_v33, %v29_v30  ;;  %v56_v42 = vrot.slane %v55_v39, 2 }
  0x23   :  { %v32_v37 = vrot.slane %v31_v36, 1  ;;  %v57_v44 = vadd.f32 %v56_v42, %v55_v39 }
  0x25   :  { %v33_v40 = vadd.f32 %v32_v37, %v31_v36  ;;  %v58_v50 = vrot.slane %v57_v44, 1 }
  0x27   :  { %107 = vlog2.f32 %v33_v40  ;;  %v71_v51 = vand.u32 2147483648, %v33_v40  ;;  %vm65_vm6 = vweird.f32 %v33_v40  ;;  %v69_v53 = vand.u32 2147483647, %v33_v40 }
  0x28   :  { %109 = vrcp.f32 %v33_v40  ;;  %v59_v56 = vadd.f32 %v58_v50, %v57_v44 }
  0x29   :  { %v72_v55 = vor.u32 1.1754944e-38, %v71_v51  ;;  %vm70_vm9 = vcmp.eq.f32.partialorder %v69_v53, 8.507059e+37 }
  0x2d   :  { %v108_v45 = vpop.eup %107 }
  0x2e   :  { %v110_v46 = vpop.eup %109  ;;  %v35_v47 = vmul.f32 0.6931472, %v108_v45 }
  0x2f   :  { %v61_v48 = vmul.f32 %v110_v46, %v33_v40  ;;  %vm66_vm7 = vweird.f32 %v110_v46 }
  0x30   :  { %v50_v49 = vsub.f32 %v49_v43, %v35_v47  ;;  %vm67_vm8 = vmor %vm65_vm6, %vm66_vm7 }
  0x31   :  { %v62_v52 = vsub.f32 1.0, %v61_v48 }
  0x32   :  { %51 = vst [vmem:[%s160_s2] sm:$0x1] %v50_v49 }
  0x33   :  { %v63_v54 = vmul.f32 %v110_v46, %v62_v52 }
  0x35   :  { %v64_v57 = vadd.f32 %v110_v46, %v63_v54 }
  0x37   :  { %v68_v58 = vsel %vm67_vm8, %v110_v46, %v64_v57 }
  0x38   :  { %v73_v59 = vsel %vm70_vm9, %v72_v55, %v68_v58 }
  0x39   :  { %v74_v60 = vmul.f32 %v73_v59, %v59_v56 }
  0x3b   :  { %v75_v61 = vsub.f32 %v35_v47, %v74_v60 }
  0x3d   :  { %76 = vst [vmem:[%s161_s3] sm:$0x1] %v75_v61 }

</bundles_post_ra>
